<compile_context>
chip_gen: v6e
topology: v6e:2x2x1
jax: 0.10.0
libtpu: 0.0.40
codegen_flags: <defaults>
</compile_context>

<pallas_src>
import functools

import jax
import jax.numpy as jnp
from jax.experimental import pallas as pl
from jax.experimental.pallas import tpu as pltpu


def _round_up(x, m):
    return (x + m - 1) // m * m


def _celu(x):
    # CELU(alpha=1): x if x > 0 else exp(x) - 1.
    # exp(min(x,0)) - 1 kept (instead of expm1) for guaranteed Mosaic lowering;
    # within the 1e-5 f32 tolerance used below (known small-|x| cancellation gap).
    return jnp.where(x > 0.0, x, jnp.exp(jnp.minimum(x, 0.0)) - 1.0)


def _pad2d(a, rows, cols, dtype=None):
    """Cast + zero-pad a 2-D array to (rows, cols); no-op when already aligned."""
    dtype = a.dtype if dtype is None else jnp.dtype(dtype)
    r, c = a.shape
    out = a if a.dtype == dtype else a.astype(dtype)
    if (r, c) != (rows, cols):
        out = jnp.pad(out, ((0, rows - r), (0, cols - c)))
    return out


def _pick_row_tile(M, tm_max):
    """Row tile (multiple of 8) that minimizes zero-row padding for ragged M and
    yields >= 2 grid steps whenever M >= 16 (megacore sharding on v7x)."""
    M8 = _round_up(max(M, 1), 8)
    if M8 <= 8:
        return 8, M8
    cap = max(8, min(_round_up(tm_max, 8), _round_up((M8 + 1) // 2, 8)))
    best_t, best_mp = None, None
    t = cap
    while t >= 8:
        mp = _round_up(M8, t)
        if best_mp is None or mp < best_mp:   # prefer minimal padding; ties -> larger tile
            best_t, best_mp = t, mp
        t -= 8
    return best_t, best_mp


def _vmem_capacity_bytes():
    try:
        cap = getattr(pltpu.get_tpu_info(), "vmem_capacity_bytes", None)
        if cap:
            return int(cap)
    except Exception:
        pass
    return 64 << 20  # conservative: valid request on every current TPU generation


def gated_ff_kernel(x_ref, wa_ref, ba_ref, wbm_ref, bbm_ref, o_ref, *, o_half):
    w_dtype = wa_ref.dtype

    # linA + CELU. Only the dot operand is cast to the (bf16) weight dtype; MXU
    # accumulation (preferred_element_type) and the bias add stay f32.
    pre = jnp.dot(x_ref[...].astype(w_dtype), wa_ref[...],
                  preferred_element_type=jnp.float32) + ba_ref[...]
    act = _celu(pre)                                           # (tm, Zp), f32

    # Fused linB | linMix: one MXU pass over the concatenated [Zp, 2*Op] weight.
    cm = jnp.dot(act.astype(w_dtype), wbm_ref[...],
                 preferred_element_type=jnp.float32) + bbm_ref[...]
    cand = cm[:, :o_half]                                      # (tm, Op), f32
    mix = jax.nn.sigmoid(cm[:, o_half:])                       # (tm, Op), f32

    # h re-read here (not held live in f32 across both matmuls); 3-op gate:
    # cand + mix*(h - cand) == h*mix + cand*(1 - mix).
    h = x_ref[...].astype(jnp.float32)
    o_ref[...] = (cand + mix * (h - cand)).astype(o_ref.dtype)


def pack_gated_ff_params(wa, ba, wb, bb, wm, bm, *, weight_dtype=jnp.bfloat16):
    """One-time weight packing: lane-dense (multiple-of-128) zero padding, fused
    [Wb | Wm] / [bb | bm], and cast of the MXU weight operands to `weight_dtype`
    (default bf16; biases stay f32).  Hoisted out of the per-call path."""
    D, Z = wa.shape
    O = wb.shape[1]
    assert wb.shape == (Z, O) and wm.shape == (Z, O)
    wdt = jnp.dtype(weight_dtype)
    D_p, Z_p, O_p = _round_up(D, 128), _round_up(Z, 128), _round_up(O, 128)

    wa_p = _pad2d(wa, D_p, Z_p, wdt)
    ba_p = _pad2d(jnp.asarray(ba, jnp.float32).reshape(1, Z), 1, Z_p)
    wbm_p = jnp.concatenate(
        [_pad2d(wb, Z_p, O_p, wdt), _pad2d(wm, Z_p, O_p, wdt)], axis=1)
    bbm_p = jnp.concatenate(
        [_pad2d(jnp.asarray(bb, jnp.float32).reshape(1, O), 1, O_p),
         _pad2d(jnp.asarray(bm, jnp.float32).reshape(1, O), 1, O_p)], axis=1)
    return dict(wa=wa_p, ba=ba_p, wbm=wbm_p, bbm=bbm_p,
                D=D, Z=Z, O=O, D_p=D_p, Z_p=Z_p, O_p=O_p)


_SINGLE_BUFFER_OK = None  # memoized: does this jax accept pipeline_mode=pl.Buffered(1)?


def gated_ff(x, params, *, tm=256):
    """GatedFF forward.  x: [..., D]; params: output of pack_gated_ff_params.
    Requires odim == indim (single-input gating).  Returns same shape/dtype as x."""
    global _SINGLE_BUFFER_OK

    D, Z, O = params["D"], params["Z"], params["O"]
    D_p, Z_p, O_p = params["D_p"], params["Z_p"], params["O_p"]
    assert O == D, "GatedFF gating (h * mix) requires odim == indim for a single input"
    assert x.shape[-1] == D

    orig_shape = x.shape
    x2 = x.reshape(-1, D)
    M = x2.shape[0]

    tm_eff, M_p = _pick_row_tile(M, tm)
    grid_m = M_p // tm_eff

    # x keeps its own dtype (h fidelity); padding is a no-op when already aligned.
    x_p = _pad2d(x2, M_p, D_p)

    w_itm = jnp.dtype(params["wa"].dtype).itemsize
    x_itm = jnp.dtype(x.dtype).itemsize

    def _vmem_limit(weight_buffers):
        weight_bytes = weight_buffers * ((D_p * Z_p + Z_p * 2 * O_p) * w_itm
                                         + (Z_p + 2 * O_p) * 4)
        io_bytes = 2 * tm_eff * (D_p + O_p) * x_itm            # x / out double-buffered
        live_bytes = tm_eff * (D_p + Z_p + 3 * O_p) * 4        # f32 temps (pre/act/cm/h)
        est = int(1.3 * (weight_bytes + io_bytes + live_bytes)) + (4 << 20)
        cap = int(0.9 * _vmem_capacity_bytes())                # v7x: ~57 MiB; never over-promise
        return max(min(32 << 20, cap), min(est, cap))

    def _weight_specs(single_buffer):
        shapes = [((D_p, Z_p), lambda i: (0, 0)),              # Wa
                  ((1, Z_p), lambda i: (0, 0)),                # ba (f32)
                  ((Z_p, 2 * O_p), lambda i: (0, 0)),          # [Wb | Wm]
                  ((1, 2 * O_p), lambda i: (0, 0))]            # [bb | bm] (f32)
        if single_buffer:
            # Constant index_map -> single-buffer these blocks (no DMA after step 0).
            return [pl.BlockSpec(s, m, pipeline_mode=pl.Buffered(1)) for s, m in shapes]
        return [pl.BlockSpec(s, m) for s, m in shapes]

    kernel = functools.partial(gated_ff_kernel, o_half=O_p)

    def _run(single_buffer):
        out = pl.pallas_call(
            kernel,
            out_shape=jax.ShapeDtypeStruct((M_p, O_p), x.dtype),
            grid_spec=pltpu.PrefetchScalarGridSpec(
                num_scalar_prefetch=0,
                grid=(grid_m,),
                in_specs=[pl.BlockSpec((tm_eff, D_p), lambda i: (i, 0))]   # x rows
                         + _weight_specs(single_buffer),
                out_specs=pl.BlockSpec((tm_eff, O_p), lambda i: (i, 0)),
            ),
            compiler_params=pltpu.CompilerParams(
                dimension_semantics=("parallel",),
                vmem_limit_bytes=_vmem_limit(1 if single_buffer else 2),
            ),
        )(x_p, params["wa"], params["ba"], params["wbm"], params["bbm"])
        return jax.block_until_ready(out)

    if _SINGLE_BUFFER_OK is not False:
        try:
            out_p = _run(True)
            _SINGLE_BUFFER_OK = True
        except Exception:
            # pipeline_mode=pl.Buffered(1) unsupported on this jax/Mosaic build.
            _SINGLE_BUFFER_OK = False
            out_p = _run(False)
    else:
        out_p = _run(False)

    return out_p[:M, :O].reshape(orig_shape)


def gated_ff_reference(x, wa, ba, wb, bb, wm, bm):
    h = x
    pre = x @ wa + ba
    act = jnp.where(pre > 0, pre, jnp.exp(jnp.minimum(pre, 0.0)) - 1.0)  # CELU(1)
    cand = act @ wb + bb
    mix = jax.nn.sigmoid(act @ wm + bm)
    return h * mix + cand * (1 - mix)


def _make_params(key, D, Z, O):
    ka, kab, kb, kbb, km, kmb = jax.random.split(key, 6)
    wa = jax.random.uniform(ka, (D, Z), jnp.float32, -1.0, 1.0) / jnp.sqrt(D)
    ba = jax.random.uniform(kab, (1, Z), jnp.float32, -1.0, 1.0) / jnp.sqrt(D)
    wb = jax.random.uniform(kb, (Z, O), jnp.float32, -1.0, 1.0) / jnp.sqrt(Z)
    bb = jax.random.uniform(kbb, (1, O), jnp.float32, -1.0, 1.0) / jnp.sqrt(Z)
    wm = jax.random.uniform(km, (Z, O), jnp.float32, -1.0, 1.0) / jnp.sqrt(Z)
    bm = jax.random.uniform(kmb, (1, O), jnp.float32, -1.0, 1.0) / jnp.sqrt(Z)
    return wa, ba, wb, bb, wm, bm


if __name__ == "__main__":
    key = jax.random.PRNGKey(0)
    k1, k2, k3, k4 = jax.random.split(key, 4)

    # --- Test 1: small aligned shapes (batch=2, seq=8, indim=odim=32, zdim=128), f32. ---
    B, S, D = 2, 8, 32
    Z, O = 4 * D, D
    x = jax.random.normal(k1, (B, S, D), dtype=jnp.float32)
    raw = _make_params(k2, D, Z, O)

    packed_f32 = pack_gated_ff_params(*raw, weight_dtype=jnp.float32)
    out = gated_ff(x, packed_f32)
    ref = gated_ff_reference(x.reshape(-1, D), *raw).reshape(B, S, D)
    assert out.shape == (B, S, D)
    assert jnp.allclose(out, ref, atol=1e-5, rtol=1e-5), "f32 mismatch vs reference"

    # --- Test 2: ragged rows + non-128 feature dims exercise padding / tile picking. ---
    B2, S2, D2 = 3, 7, 48
    Z2, O2 = 4 * D2, D2
    x2 = jax.random.normal(k3, (B2, S2, D2), dtype=jnp.float32)
    raw2 = _make_params(k4, D2, Z2, O2)
    packed2_f32 = pack_gated_ff_params(*raw2, weight_dtype=jnp.float32)
    out2 = gated_ff(x2, packed2_f32)
    ref2 = gated_ff_reference(x2.reshape(-1, D2), *raw2).reshape(B2, S2, D2)
    assert out2.shape == (B2, S2, D2)
    assert jnp.allclose(out2, ref2, atol=1e-5, rtol=1e-5), "padded f32 mismatch"

    # --- Test 3: default bf16 MXU-operand path (f32 accumulate + f32 epilogue). ---
    packed_bf16 = pack_gated_ff_params(*raw)   # weight_dtype defaults to bf16
    out_bf16 = gated_ff(x, packed_bf16)
    assert out_bf16.shape == (B, S, D)
    assert jnp.allclose(out_bf16, ref, atol=1e-1, rtol=1e-1), "bf16 path mismatch"

    print("KERNEL_OK")
</pallas_src>

<mosaic_0001>
module attributes {stable_mosaic.version = 11 : i64} {
  func.func @gated_ff_kernel(%arg0: i32, %arg1: memref<8x128xf32, #tpu.memory_space<vmem>>, %arg2: memref<128x128xf32, #tpu.memory_space<vmem>>, %arg3: memref<1x128xf32, #tpu.memory_space<vmem>>, %arg4: memref<128x256xf32, #tpu.memory_space<vmem>>, %arg5: memref<1x256xf32, #tpu.memory_space<vmem>>, %arg6: memref<8x128xf32, #tpu.memory_space<vmem>>) attributes {dimension_semantics = [#tpu.dimension_semantics<parallel>], iteration_bounds = array<i64: 2>, scalar_prefetch = 0 : i64, scratch_operands = 0 : i64, tpu.core_type = #tpu.core_type<tc>, window_params = [{transform_indices = @transform_0, window_bounds = array<i64: 8, 128>}, {pipeline_mode = #tpu.pipeline_mode<synchronous>, transform_indices = @transform_1, window_bounds = array<i64: 128, 128>}, {pipeline_mode = #tpu.pipeline_mode<synchronous>, transform_indices = @transform_2, window_bounds = array<i64: 1, 128>}, {pipeline_mode = #tpu.pipeline_mode<synchronous>, transform_indices = @transform_3, window_bounds = array<i64: 128, 256>}, {pipeline_mode = #tpu.pipeline_mode<synchronous>, transform_indices = @transform_4, window_bounds = array<i64: 1, 256>}, {transform_indices = @transform_5, window_bounds = array<i64: 8, 128>}]} {
    %c0 = arith.constant 0 : index
    %c0_0 = arith.constant 0 : index
    %0 = vector.load %arg1[%c0, %c0_0] : memref<8x128xf32, #tpu.memory_space<vmem>>, vector<8x128xf32>
    %c0_1 = arith.constant 0 : index
    %c0_2 = arith.constant 0 : index
    %1 = vector.load %arg2[%c0_1, %c0_2] : memref<128x128xf32, #tpu.memory_space<vmem>>, vector<128x128xf32>
    %cst = arith.constant dense<0.000000e+00> : vector<8x128xf32>
    %2 = tpu.matmul %0, %1, %cst {dimension_numbers = #tpu.dot_dimension_numbers<[1], [0], [0], [1], [0, 0, 1, 1], [], []>} : vector<8x128xf32>, vector<128x128xf32>, vector<8x128xf32> -> vector<8x128xf32>
    %c0_3 = arith.constant 0 : index
    %c0_4 = arith.constant 0 : index
    %3 = vector.load %arg3[%c0_3, %c0_4] : memref<1x128xf32, #tpu.memory_space<vmem>>, vector<1x128xf32>
    %4 = vector.broadcast %3 : vector<1x128xf32> to vector<8x128xf32>
    %5 = arith.addf %2, %4 : vector<8x128xf32>
    %cst_5 = arith.constant 0.000000e+00 : f32
    %6 = vector.broadcast %cst_5 : f32 to vector<8x128xf32>
    %7 = arith.cmpf ogt, %5, %6 : vector<8x128xf32>
    %cst_6 = arith.constant 0.000000e+00 : f32
    %8 = vector.broadcast %cst_6 : f32 to vector<8x128xf32>
    %9 = arith.minimumf %5, %8 : vector<8x128xf32>
    %10 = math.exp %9 : vector<8x128xf32>
    %cst_7 = arith.constant 1.000000e+00 : f32
    %11 = vector.broadcast %cst_7 : f32 to vector<8x128xf32>
    %12 = arith.subf %10, %11 : vector<8x128xf32>
    %13 = arith.select %7, %5, %12 : vector<8x128xi1>, vector<8x128xf32>
    %c0_8 = arith.constant 0 : index
    %c0_9 = arith.constant 0 : index
    %14 = vector.load %arg4[%c0_8, %c0_9] : memref<128x256xf32, #tpu.memory_space<vmem>>, vector<128x256xf32>
    %cst_10 = arith.constant dense<0.000000e+00> : vector<8x256xf32>
    %15 = tpu.matmul %13, %14, %cst_10 {dimension_numbers = #tpu.dot_dimension_numbers<[1], [0], [0], [1], [0, 0, 1, 1], [], []>} : vector<8x128xf32>, vector<128x256xf32>, vector<8x256xf32> -> vector<8x256xf32>
    %c0_11 = arith.constant 0 : index
    %c0_12 = arith.constant 0 : index
    %16 = vector.load %arg5[%c0_11, %c0_12] : memref<1x256xf32, #tpu.memory_space<vmem>>, vector<1x256xf32>
    %17 = vector.broadcast %16 : vector<1x256xf32> to vector<8x256xf32>
    %18 = arith.addf %15, %17 : vector<8x256xf32>
    %19 = vector.extract_strided_slice %18 {offsets = [0, 0], sizes = [8, 128], strides = [1, 1]} : vector<8x256xf32> to vector<8x128xf32>
    %20 = vector.extract_strided_slice %18 {offsets = [0, 128], sizes = [8, 128], strides = [1, 1]} : vector<8x256xf32> to vector<8x128xf32>
    %21 = arith.negf %20 : vector<8x128xf32>
    %22 = math.exp %21 : vector<8x128xf32>
    %cst_13 = arith.constant 1.000000e+00 : f32
    %23 = vector.broadcast %cst_13 : f32 to vector<8x128xf32>
    %24 = arith.addf %23, %22 : vector<8x128xf32>
    %25 = arith.divf %23, %24 : vector<8x128xf32>
    %c0_14 = arith.constant 0 : index
    %c0_15 = arith.constant 0 : index
    %26 = vector.load %arg1[%c0_14, %c0_15] : memref<8x128xf32, #tpu.memory_space<vmem>>, vector<8x128xf32>
    %27 = arith.subf %26, %19 : vector<8x128xf32>
    %28 = arith.mulf %25, %27 : vector<8x128xf32>
    %29 = arith.addf %19, %28 : vector<8x128xf32>
    %c0_16 = arith.constant 0 : index
    %c0_17 = arith.constant 0 : index
    %30 = vector.load %arg6[%c0_16, %c0_17] : memref<8x128xf32, #tpu.memory_space<vmem>>, vector<8x128xf32>
    tpu.vector_store %arg6[%c0_16, %c0_17], %29 {strides = array<i32>} : memref<8x128xf32, #tpu.memory_space<vmem>>, vector<8x128xf32>,
    return
  }
  func.func @transform_0(%arg0: i32) -> (i32, i32) {
    %c0_i32 = arith.constant 0 : i32
    %c0_i32_0 = arith.constant 0 : i32
    return %arg0, %c0_i32 : i32, i32
  }
  func.func @transform_1(%arg0: i32) -> (i32, i32) {
    %c0_i32 = arith.constant 0 : i32
    %c0_i32_0 = arith.constant 0 : i32
    %c0_i32_1 = arith.constant 0 : i32
    return %c0_i32, %c0_i32_0 : i32, i32
  }
  func.func @transform_2(%arg0: i32) -> (i32, i32) {
    %c0_i32 = arith.constant 0 : i32
    %c0_i32_0 = arith.constant 0 : i32
    %c0_i32_1 = arith.constant 0 : i32
    return %c0_i32, %c0_i32_0 : i32, i32
  }
  func.func @transform_3(%arg0: i32) -> (i32, i32) {
    %c0_i32 = arith.constant 0 : i32
    %c0_i32_0 = arith.constant 0 : i32
    %c0_i32_1 = arith.constant 0 : i32
    return %c0_i32, %c0_i32_0 : i32, i32
  }
  func.func @transform_4(%arg0: i32) -> (i32, i32) {
    %c0_i32 = arith.constant 0 : i32
    %c0_i32_0 = arith.constant 0 : i32
    %c0_i32_1 = arith.constant 0 : i32
    return %c0_i32, %c0_i32_0 : i32, i32
  }
  func.func @transform_5(%arg0: i32) -> (i32, i32) {
    %c0_i32 = arith.constant 0 : i32
    %c0_i32_0 = arith.constant 0 : i32
    return %arg0, %c0_i32 : i32, i32
  }
}

module attributes {stable_mosaic.version = 11 : i64} {
  func.func @gated_ff_kernel(%arg0: i32, %arg1: memref<8x128xf32, #tpu.memory_space<vmem>>, %arg2: memref<128x128xf32, #tpu.memory_space<vmem>>, %arg3: memref<1x128xf32, #tpu.memory_space<vmem>>, %arg4: memref<128x256xf32, #tpu.memory_space<vmem>>, %arg5: memref<1x256xf32, #tpu.memory_space<vmem>>, %arg6: memref<8x128xf32, #tpu.memory_space<vmem>>) attributes {dimension_semantics = [#tpu.dimension_semantics<parallel>], iteration_bounds = array<i64: 2>, scalar_prefetch = 0 : i64, scratch_operands = 0 : i64, tpu.core_type = #tpu.core_type<tc>, window_params = [{transform_indices = @transform_0, window_bounds = array<i64: 8, 128>}, {pipeline_mode = #tpu.pipeline_mode<synchronous>, transform_indices = @transform_1, window_bounds = array<i64: 128, 128>}, {pipeline_mode = #tpu.pipeline_mode<synchronous>, transform_indices = @transform_2, window_bounds = array<i64: 1, 128>}, {pipeline_mode = #tpu.pipeline_mode<synchronous>, transform_indices = @transform_3, window_bounds = array<i64: 128, 256>}, {pipeline_mode = #tpu.pipeline_mode<synchronous>, transform_indices = @transform_4, window_bounds = array<i64: 1, 256>}, {transform_indices = @transform_5, window_bounds = array<i64: 8, 128>}]} {
    %c0 = arith.constant 0 : index
    %c0_0 = arith.constant 0 : index
    %0 = vector.load %arg1[%c0, %c0_0] : memref<8x128xf32, #tpu.memory_space<vmem>>, vector<8x128xf32>
    %c0_1 = arith.constant 0 : index
    %c0_2 = arith.constant 0 : index
    %1 = vector.load %arg2[%c0_1, %c0_2] : memref<128x128xf32, #tpu.memory_space<vmem>>, vector<128x128xf32>
    %cst = arith.constant dense<0.000000e+00> : vector<8x128xf32>
    %2 = tpu.matmul %0, %1, %cst {dimension_numbers = #tpu.dot_dimension_numbers<[1], [0], [0], [1], [0, 0, 1, 1], [], []>} : vector<8x128xf32>, vector<128x128xf32>, vector<8x128xf32> -> vector<8x128xf32>
    %c0_3 = arith.constant 0 : index
    %c0_4 = arith.constant 0 : index
    %3 = vector.load %arg3[%c0_3, %c0_4] : memref<1x128xf32, #tpu.memory_space<vmem>>, vector<1x128xf32>
    %4 = vector.broadcast %3 : vector<1x128xf32> to vector<8x128xf32>
    %5 = arith.addf %2, %4 : vector<8x128xf32>
    %cst_5 = arith.constant 0.000000e+00 : f32
    %6 = vector.broadcast %cst_5 : f32 to vector<8x128xf32>
    %7 = arith.cmpf ogt, %5, %6 : vector<8x128xf32>
    %cst_6 = arith.constant 0.000000e+00 : f32
    %8 = vector.broadcast %cst_6 : f32 to vector<8x128xf32>
    %9 = arith.minimumf %5, %8 : vector<8x128xf32>
    %10 = math.exp %9 : vector<8x128xf32>
    %cst_7 = arith.constant 1.000000e+00 : f32
    %11 = vector.broadcast %cst_7 : f32 to vector<8x128xf32>
    %12 = arith.subf %10, %11 : vector<8x128xf32>
    %13 = arith.select %7, %5, %12 : vector<8x128xi1>, vector<8x128xf32>
    %c0_8 = arith.constant 0 : index
    %c0_9 = arith.constant 0 : index
    %14 = vector.load %arg4[%c0_8, %c0_9] : memref<128x256xf32, #tpu.memory_space<vmem>>, vector<128x256xf32>
    %cst_10 = arith.constant dense<0.000000e+00> : vector<8x256xf32>
    %15 = tpu.matmul %13, %14, %cst_10 {dimension_numbers = #tpu.dot_dimension_numbers<[1], [0], [0], [1], [0, 0, 1, 1], [], []>} : vector<8x128xf32>, vector<128x256xf32>, vector<8x256xf32> -> vector<8x256xf32>
    %c0_11 = arith.constant 0 : index
    %c0_12 = arith.constant 0 : index
    %16 = vector.load %arg5[%c0_11, %c0_12] : memref<1x256xf32, #tpu.memory_space<vmem>>, vector<1x256xf32>
    %17 = vector.broadcast %16 : vector<1x256xf32> to vector<8x256xf32>
    %18 = arith.addf %15, %17 : vector<8x256xf32>
    %19 = vector.extract_strided_slice %18 {offsets = [0, 0], sizes = [8, 128], strides = [1, 1]} : vector<8x256xf32> to vector<8x128xf32>
    %20 = vector.extract_strided_slice %18 {offsets = [0, 128], sizes = [8, 128], strides = [1, 1]} : vector<8x256xf32> to vector<8x128xf32>
    %21 = arith.negf %20 : vector<8x128xf32>
    %22 = math.exp %21 : vector<8x128xf32>
    %cst_13 = arith.constant 1.000000e+00 : f32
    %23 = vector.broadcast %cst_13 : f32 to vector<8x128xf32>
    %24 = arith.addf %23, %22 : vector<8x128xf32>
    %25 = arith.divf %23, %24 : vector<8x128xf32>
    %c0_14 = arith.constant 0 : index
    %c0_15 = arith.constant 0 : index
    %26 = vector.load %arg1[%c0_14, %c0_15] : memref<8x128xf32, #tpu.memory_space<vmem>>, vector<8x128xf32>
    %27 = arith.subf %26, %19 : vector<8x128xf32>
    %28 = arith.mulf %25, %27 : vector<8x128xf32>
    %29 = arith.addf %19, %28 : vector<8x128xf32>
    %c0_16 = arith.constant 0 : index
    %c0_17 = arith.constant 0 : index
    %30 = vector.load %arg6[%c0_16, %c0_17] : memref<8x128xf32, #tpu.memory_space<vmem>>, vector<8x128xf32>
    tpu.vector_store %arg6[%c0_16, %c0_17], %29 {strides = array<i32>} : memref<8x128xf32, #tpu.memory_space<vmem>>, vector<8x128xf32>,
    return
  }
  func.func @transform_0(%arg0: i32) -> (i32, i32) {
    %c0_i32 = arith.constant 0 : i32
    %c0_i32_0 = arith.constant 0 : i32
    return %arg0, %c0_i32 : i32, i32
  }
  func.func @transform_1(%arg0: i32) -> (i32, i32) {
    %c0_i32 = arith.constant 0 : i32
    %c0_i32_0 = arith.constant 0 : i32
    %c0_i32_1 = arith.constant 0 : i32
    return %c0_i32, %c0_i32_0 : i32, i32
  }
  func.func @transform_2(%arg0: i32) -> (i32, i32) {
    %c0_i32 = arith.constant 0 : i32
    %c0_i32_0 = arith.constant 0 : i32
    %c0_i32_1 = arith.constant 0 : i32
    return %c0_i32, %c0_i32_0 : i32, i32
  }
  func.func @transform_3(%arg0: i32) -> (i32, i32) {
    %c0_i32 = arith.constant 0 : i32
    %c0_i32_0 = arith.constant 0 : i32
    %c0_i32_1 = arith.constant 0 : i32
    return %c0_i32, %c0_i32_0 : i32, i32
  }
  func.func @transform_4(%arg0: i32) -> (i32, i32) {
    %c0_i32 = arith.constant 0 : i32
    %c0_i32_0 = arith.constant 0 : i32
    %c0_i32_1 = arith.constant 0 : i32
    return %c0_i32, %c0_i32_0 : i32, i32
  }
  func.func @transform_5(%arg0: i32) -> (i32, i32) {
    %c0_i32 = arith.constant 0 : i32
    %c0_i32_0 = arith.constant 0 : i32
    return %arg0, %c0_i32 : i32, i32
  }
}

</mosaic_0001>

<bundles_post_ra>
// kernel: tpu_custom_call.1
= control target key start
LH: loop header
LB: loop body
LE: loop exit
PB: predicated region body
PF: predicated region fallthrough
CT: control target
= control target key end

     0   :  { %10 = vsyncpa [#allocation3], 0  ;;  %s1137_s0 = inlined_call_operand.hbm [shape: f32[16,128], index: 0, kind: input, shape index: {}]   ;;  %s1138_s1 = inlined_call_operand.hbm [shape: f32[128,128], index: 1, kind: input, shape index: {}]   ;;  %s1139_s2 = inlined_call_operand.vmem [shape: f32[1,128], index: 2, kind: input, shape index: {}]   ;;  %s1140_s3 = inlined_call_operand.hbm [shape: f32[128,256], index: 3, kind: input, shape index: {}]   ;;  %s1141_s4 = inlined_call_operand.vmem [shape: f32[1,256], index: 4, kind: input, shape index: {}]   ;;  %s1142_s5 = inlined_call_operand.hbm [shape: f32[16,128], index: 5, kind: output, shape index: {}]  }
   0x1   :  { %12 = vsyncpa [#allocation3 + $0x1], 0 }
   0x2   :  { %13 = vsyncpa [#allocation6], 0 }
   0x3   :  { %14 = vsyncpa [#allocation4], 0 }
   0x4   :  { %16 = vsyncpa [#allocation4 + $0x1], 0  ;;  %s937_s18 = smov 0   ;;  %s939_s19 = smov 0  }
   0x5   :  { %s941_s20 = smov 0   ;;  %s943_s21 = smov 0  }
   0x6 LB: > { %s958_s22 = sadd.s32 4294967295, %s895_s21   ;;  %s597_s23 = sadd.s32 4294967294, %s895_s21   ;;  %s895_s21 = sphi %s943_s21, %s1164_s21   ;;  %s891_s20 = sphi %s941_s20, %s1163_s20   ;;  %s887_s19 = sphi %s939_s19, %s1162_s19   ;;  %s883_s18 = sphi %s937_s18, %s1161_s18  }
   0x7   : > { %p42_p0 = scmp.ne.s32.totalorder %s887_s19, %s883_s18  ;;  %p1143_p1 = scmp.eq.s32.totalorder %s958_s22, 0 }
   0x8   : > { %p156_p3 = scmp.eq.s32.totalorder %s597_s23, 1  ;;  %p598_p5 = scmp.ge.s32.totalorder %s895_s21, 1 }
   0x9   : > { %p967_p4 = por %p1143_p1, %p42_p0  ;;  %p163_p7 = scmp.lt.s32.totalorder %s895_s21, 3 }
   0xa   : > { %p972_p6 = por %p156_p3, %p42_p0  ;;  %s897_s27 = smov [#allocation5]  }
   0xb   : > { %s1147_s24 = scalar_select %p967_p4, 1, 0 }
   0xc   : > { %s1148_s25 = scalar_select %p972_p6, 1, 0 }
   0xd   : > { %p977_p8 = pnand %p598_p5, %p163_p7  ;;  %s175_s28 = sshll.u32 %s897_s27, 4  ;;  %s176_s28 = int_to_ptr.vmem [resolvable:$true] %s175_s28 }
   0xe   : > { %s898_s30 = smov [#allocation7]   ;;  %s758_s7 = scalar_lea.vmem %s176_s28, 2048 }
   0xf   : > { %s1149_s26 = scalar_select %p977_p8, 1, 0 }
  0x10   : > { %p680_p9 = pneg %p977_p8  ;;  %s191_s6 = sshll.u32 %s898_s30, 4  ;;  %s192_s6 = int_to_ptr.vmem [resolvable:$true] %s191_s6 }
  0x11   : > { %p759_p13 = scmp.ne.s32.totalorder %s176_s28, %s758_s7  ;;  %p766_p5 = scmp.lt.s32.totalorder %s176_s28, %s176_s28 }
  0x12   : > { %p986_p11 = pnand %p680_p9, %p1143_p1  ;;  %p767_p7 = scmp.lt.s32.totalorder %s758_s7, %s758_s7 }
  0x14   : > { %p749_p12 = pneg %p986_p11  ;;  %p768_p10 = por %p767_p7, %p766_p5 }
  0x16   : > { %p761_p0 = pnand %p759_p13, %p749_p12 }
  0x18   : > { %p762_p3 = pneg %p761_p0 }
  0x1a   : > { %p769_p9 = pnand %p768_p10, %p762_p3 }
  0x1c   : > { %772 = shalt.err (!%p769_p9)
}
  0x1d   : > { %s899_s8 = smov 128   ;;  %s900_s9 = smov 8  }
  0x1e   : > { %683 = dma.hbm_to_vmem [thread:$0]  (!%p986_p11), %s1138_s1, 2048, %s176_s28, [#allocation6], %s899_s8, %s899_s8, %s900_s9  }
  0x1f   : > { %s784_s12 = scalar_lea.vmem %s192_s6, 4096  ;;  %p792_p2 = scmp.lt.s32.totalorder %s192_s6, %s192_s6 }
  0x20   : > { %p785_p1 = scmp.ne.s32.totalorder %s192_s6, %s784_s12  ;;  %p793_p6 = scmp.lt.s32.totalorder %s784_s12, %s784_s12 }
  0x22   : > { %p787_p13 = pnand %p785_p1, %p749_p12  ;;  %p794_p5 = por %p793_p6, %p792_p2 }
  0x24   : > { %p788_p0 = pneg %p787_p13 }
  0x26   : > { %p795_p10 = pnand %p794_p5, %p788_p0 }
  0x28   : > { %798 = shalt.err (!%p795_p10)
}
  0x29   : > { %s901_s13 = smov 256   ;;  %s902_s14 = smov 16  }
  0x2a   : > { %686 = dma.hbm_to_vmem [thread:$0]  (!%p986_p11), %s1140_s3, 4096, %s192_s6, [#allocation6], %s901_s13, %s901_s13, %s902_s14  }
  0x2b   : > { %s1009_s17 = sadd.s32 1, %s895_s21   ;;  %s29_s27 = sadd.s32 1, %s891_s20 }
  0x2c   : > { %s26_s23 = ssub.s32 %s895_s21, %s1009_s17  ;;  %p36_p2 = scmp.ne.s32.totalorder %s891_s20, %s887_s19 }
  0x2d   : > { %p27_p1 = scmp.eq.s32.totalorder %s26_s23, 0  ;;  %p37_p6 = scmp.eq.s32.totalorder %s895_s21, 0 }
  0x2e   : > { %p1151_p3 = scmp.eq.s32.totalorder %s958_s22, 1  ;;  %p697_p9 = scmp.lt.s32.totalorder %s895_s21, 2 }
  0x2f   : > { %s1018_s28 = scalar_select %p27_p1, %s891_s20, %s29_s27  }
  0x30   : > { %p38_p12 = por %p37_p6, %p36_p2  ;;  %p1022_p7 = por %p1151_p3, %p36_p2 }
  0x31   : > { %s208_s29 = sand.u32 1, %s891_s20   ;;  %s603_s6 = sshll.u32 %s895_s21, 7 }
  0x32   : > { %s1152_s30 = scalar_select %p1022_p7, 1, 0 }
  0x33   : > { %s602_s7 = sshll.u32 %s208_s29, 3  ;;  %s1032_s10 = scalar_lea.hbm %s1137_s0, %s603_s6 }
  0x34   : > { %s212_s11 = scalar_lea.vmem [#allocation2], %s602_s7  ;;  %p1034_p11 = pnand %p697_p9, %p38_p12 }
  0x35   : > { %s219_s12 = sshll.u32 %s212_s11, 4  ;;  %s209_s14 = scalar_lea.sflag [#allocation3], %s208_s29  ;;  %s220_s12 = int_to_ptr.vmem [resolvable:$true] %s219_s12 }
  0x36   : > { %s799_s15 = scalar_lea.hbm %s1032_s10, 128  ;;  %p801_p0 = pneg %p1034_p11 }
  0x37   : > { %p800_p13 = scmp.ne.s32.totalorder %s1032_s10, %s799_s15  ;;  %s804_s27 = scalar_lea.hbm %s1137_s0, 256 }
  0x38   : > { %p805_p1 = scmp.lt.s32.totalorder %s1032_s10, %s1137_s0  ;;  %p806_p2 = scmp.lt.s32.totalorder %s804_s27, %s799_s15 }
  0x39   : > { %p802_p5 = pnand %p801_p0, %p800_p13 }
  0x3a   : > { %p807_p6 = por %p806_p2, %p805_p1 }
  0x3b   : > { %p803_p10 = pneg %p802_p5 }
  0x3d   : > { %p808_p12 = pnand %p807_p6, %p803_p10 }
  0x3f   : > { %811 = shalt.err (!%p808_p12)
}
  0x40   : > { %s812_s8 = scalar_lea.vmem %s220_s12, 128  ;;  %s903_s29 = smov [#allocation2]  }
  0x41   : > { %p813_p3 = scmp.ne.s32.totalorder %s220_s12, %s812_s8  ;;  %s817_s9 = sshll.u32 %s903_s29, 4  ;;  %s818_s9 = int_to_ptr.vmem [resolvable:$false] %s817_s9 }
  0x42   : > { %s819_s11 = scalar_lea.vmem %s818_s9, 256  ;;  %p820_p13 = scmp.lt.s32.totalorder %s220_s12, %s818_s9 }
  0x43   : > { %p815_p9 = pnand %p813_p3, %p801_p0  ;;  %p821_p5 = scmp.lt.s32.totalorder %s819_s11, %s812_s8 }
  0x45   : > { %p816_p7 = pneg %p815_p9  ;;  %p822_p4 = por %p821_p5, %p820_p13 }
  0x47   : > { %p823_p8 = pnand %p822_p4, %p816_p7 }
  0x49   : > { %826 = shalt.err (!%p823_p8)
}
  0x4a   : > { %690 = dma.hbm_to_vmem [thread:$0]  (!%p1034_p11), %s1032_s10, 128, %s220_s12, %s209_s14  }
  0x4b   : > { %p1154_p10 = scmp.ne.s32.totalorder %s1149_s26, 0 }
  0x4c   : > { %s1055_s15 = sand.u32 (!%p1154_p10), 1, %s887_s19   ;;  %p1155_p4 = scmp.ne.s32.totalorder (!%p1154_p10), %s1147_s24, 0 }
  0x4d   : > { %228 = sbr.rel (%p1154_p10) target bundleno = 581 (0x245), region = 40  ;;  %s605_s16 = sshll.u32 (!%p1154_p10), %s1055_s15, 3 }
  0x4e   : > { %s231_s23 = scalar_lea.sflag (!%p1154_p10), [#allocation3], %s1055_s15  ;;  %s1061_s27 = scalar_lea.vmem (!%p1154_p10), [#allocation2], %s605_s16 }
  0x52   : > { %870 = dma.done.wait (%p1155_p4), %s231_s23, 128  }
  0x53   : > { %872 = vsyncadd (%p1155_p4), %s231_s23, 4294967168  ;;  %p1156_p8 = scmp.eq.s32.totalorder %s958_s22, 0 }
  0x55   : > { %874 = dma.done.wait (%p1156_p8), [#allocation6], 6144   ;;  %p1157_p7 = pmov %p1156_p8 }
  0x56   : > { %v904_v0 = vmov 0.0   ;;  %vm905_vm0 = vmmov 0   ;;  %v285_v1 = vld [vmem:[#allocation5 + $0x78] sm:$0xff]  ;;  %v284_v2 = vld [vmem:[#allocation5 + $0x70] sm:$0xff]  ;;  %v283_v3 = vld [vmem:[#allocation5 + $0x68] sm:$0xff]  ;;  %v403_v59 = vlaneseq  ;;  %s613_s13 = sshll.u32 %s958_s22, 7 }
  0x57   : > { %876 = vsyncadd (%p1157_p7), [#allocation6], 4294961152  ;;  %633 = vmatprep.subr.mxu0 %v904_v0  ;;  %665 = vmatprep.mubr.msk.f32.mxu0 %vm905_vm0, %v904_v0  ;;  %v282_v4 = vld [vmem:[#allocation5 + $0x60] sm:$0xff]  ;;  %v281_v5 = vld [vmem:[#allocation5 + $0x58] sm:$0xff]  ;;  %s268_s14 = scalar_lea.vmem [#allocation8], %s605_s16  ;;  %s506_s29 = scalar_lea.hbm %s1142_s5, %s613_s13 }
  0x58   : > { %477 = vmatprep.mubr.f32.mxu1 %v904_v0  ;;  %634 = vmatpush3.msra.mxu0 %v285_v1  ;;  %v400_v6 = vld [vmem:[#allocation7 + $0xf8] sm:$0xff]  ;;  %v399_v7 = vld [vmem:[#allocation7 + $0xf0] sm:$0xff]  ;;  %v398_v8 = vld [vmem:[#allocation7 + $0xe8] sm:$0xff]  ;;  %v404_v60 = vshrl.u32 %v403_v59, 7  ;;  %s508_s6 = sshll.u32 %s268_s14, 4  ;;  %s495_s9 = scalar_lea.sflag [#allocation4], %s1055_s15  ;;  %s509_s6 = int_to_ptr.vmem [resolvable:$true] %s508_s6 }
  0x59   : > { %635 = vmatprep.subr.mxu0 %v904_v0  ;;  %413 = vmatprep.subr.mxu1 %v400_v6  ;;  %v397_v9 = vld [vmem:[#allocation7 + $0xe0] sm:$0xff]  ;;  %v396_v10 = vld [vmem:[#allocation7 + $0xd8] sm:$0xff]  ;;  %v280_v11 = vld [vmem:[#allocation5 + $0x50] sm:$0xff]  ;;  %s827_s11 = scalar_lea.vmem %s509_s6, 128  ;;  %p1158_p0 = scmp.ne.s32.totalorder %s1152_s30, 0 }
  0x5a   : > { %636 = vmatpush3.msra.mxu0 %v284_v2  ;;  %414 = vmatpush1.msra.mxu1 %v399_v7  ;;  %v395_v12 = vld [vmem:[#allocation7 + $0xd0] sm:$0xff]  ;;  %v394_v13 = vld [vmem:[#allocation7 + $0xc8] sm:$0xff]  ;;  %v393_v15 = vld [vmem:[#allocation7 + $0xc0] sm:$0xff]  ;;  %v409_v61 = vsub.s32 1, %v404_v60  ;;  %v405_v6 = vsub.s32 0, %v404_v60  ;;  %p828_p11 = scmp.ne.s32.totalorder %s509_s6, %s827_s11  ;;  %s906_s23 = smov [#allocation8]  }
  0x5b   : > { %637 = vmatprep.subr.mxu0 %v904_v0  ;;  %415 = vmatprep.subr.mxu1 %v398_v8  ;;  %v279_v14 = vld [vmem:[#allocation5 + $0x48] sm:$0xff]  ;;  %v278_v16 = vld [vmem:[#allocation5 + $0x40] sm:$0xff]  ;;  %v277_v17 = vld [vmem:[#allocation5 + $0x38] sm:$0xff] }
  0x5c   : > { %638 = vmatpush3.msra.mxu0 %v283_v3  ;;  %416 = vmatpush1.msra.mxu1 %v397_v9  ;;  %v276_v18 = vld [vmem:[#allocation5 + $0x30] sm:$0xff]  ;;  %v275_v19 = vld [vmem:[#allocation5 + $0x28] sm:$0xff]  ;;  %v274_v20 = vld [vmem:[#allocation5 + $0x20] sm:$0xff]  ;;  %p829_p1 = pnand %p828_p11, %p1158_p0 }
  0x5d   : > { %639 = vmatprep.subr.mxu0 %v904_v0  ;;  %417 = vmatprep.subr.mxu1 %v396_v10  ;;  %v273_v21 = vld [vmem:[#allocation5 + $0x18] sm:$0xff]  ;;  %v272_v22 = vld [vmem:[#allocation5 + $0x10] sm:$0xff]  ;;  %v271_v23 = vld [vmem:[#allocation5 + $0x8] sm:$0xff] }
  0x5e   : > { %640 = vmatpush3.msra.mxu0 %v282_v4  ;;  %418 = vmatpush1.msra.mxu1 %v395_v12  ;;  %v270_v24 = vld [vmem:[#allocation5] sm:$0xff]  ;;  %v1089_v25 = vld [vmem:[%s1061_s27] sm:$0xff]  ;;  %v390_v28 = vld [vmem:[#allocation7 + $0xa8] sm:$0xff]  ;;  %p830_p2 = pneg %p829_p1  ;;  %s831_s27 = sshll.u32 %s906_s23, 4  ;;  %s832_s27 = int_to_ptr.vmem [resolvable:$false] %s831_s27 }
  0x5f   : > { %641 = vmatprep.subr.mxu0 %v904_v0  ;;  %419 = vmatprep.subr.mxu1 %v394_v13  ;;  %v392_v26 = vld [vmem:[#allocation7 + $0xb8] sm:$0xff]  ;;  %v391_v27 = vld [vmem:[#allocation7 + $0xb0] sm:$0xff]  ;;  %v389_v29 = vld [vmem:[#allocation7 + $0xa0] sm:$0xff]  ;;  %s833_s22 = scalar_lea.vmem %s832_s27, 256  ;;  %p834_p6 = scmp.lt.s32.totalorder %s509_s6, %s832_s27 }
  0x60   : > { %642 = vmatpush3.msra.mxu0 %v281_v5  ;;  %420 = vmatpush1.msra.mxu1 %v393_v15  ;;  %v388_v30 = vld [vmem:[#allocation7 + $0x98] sm:$0xff]  ;;  %v387_v31 = vld [vmem:[#allocation7 + $0x90] sm:$0xff]  ;;  %v386_v32 = vld [vmem:[#allocation7 + $0x88] sm:$0xff]  ;;  %p835_p12 = scmp.lt.s32.totalorder %s833_s22, %s827_s11 }
  0x61   : > { %643 = vmatprep.subr.mxu0 %v904_v0  ;;  %421 = vmatprep.subr.mxu1 %v392_v26  ;;  %v385_v33 = vld [vmem:[#allocation7 + $0x80] sm:$0xff]  ;;  %v384_v34 = vld [vmem:[#allocation7 + $0x78] sm:$0xff]  ;;  %v383_v35 = vld [vmem:[#allocation7 + $0x70] sm:$0xff] }
  0x62   : > { %644 = vmatpush3.msra.mxu0 %v280_v11  ;;  %422 = vmatpush1.msra.mxu1 %v391_v27  ;;  %v382_v36 = vld [vmem:[#allocation7 + $0x68] sm:$0xff]  ;;  %v381_v37 = vld [vmem:[#allocation7 + $0x60] sm:$0xff]  ;;  %v380_v38 = vld [vmem:[#allocation7 + $0x58] sm:$0xff]  ;;  %p836_p3 = por %p835_p12, %p834_p6 }
  0x63   : > { %645 = vmatprep.subr.mxu0 %v904_v0  ;;  %423 = vmatprep.subr.mxu1 %v390_v28  ;;  %v379_v39 = vld [vmem:[#allocation7 + $0x50] sm:$0xff]  ;;  %v378_v40 = vld [vmem:[#allocation7 + $0x48] sm:$0xff]  ;;  %v377_v41 = vld [vmem:[#allocation7 + $0x40] sm:$0xff] }
  0x64   : > { %646 = vmatpush3.msra.mxu0 %v279_v14  ;;  %424 = vmatpush1.msra.mxu1 %v389_v29  ;;  %v376_v42 = vld [vmem:[#allocation7 + $0x38] sm:$0xff]  ;;  %v375_v43 = vld [vmem:[#allocation7 + $0x30] sm:$0xff]  ;;  %v374_v44 = vld [vmem:[#allocation7 + $0x28] sm:$0xff]  ;;  %p837_p9 = pnand %p836_p3, %p830_p2 }
  0x65   : > { %647 = vmatprep.subr.mxu0 %v904_v0  ;;  %425 = vmatprep.subr.mxu1 %v388_v30  ;;  %v373_v45 = vld [vmem:[#allocation7 + $0x20] sm:$0xff]  ;;  %v372_v46 = vld [vmem:[#allocation7 + $0x18] sm:$0xff]  ;;  %v371_v47 = vld [vmem:[#allocation7 + $0x10] sm:$0xff] }
  0x66   : > { %648 = vmatpush3.msra.mxu0 %v278_v16  ;;  %426 = vmatpush1.msra.mxu1 %v387_v31  ;;  %v370_v48 = vld [vmem:[#allocation7 + $0x8] sm:$0xff]  ;;  %v369_v49 = vld [vmem:[#allocation7] sm:$0xff]  ;;  %v609_v50 = vld [vmem:[%s1139_s2] ss:$0 sm:$0xff] }
  0x67   : > { %649 = vmatprep.subr.mxu0 %v904_v0  ;;  %427 = vmatprep.subr.mxu1 %v386_v32  ;;  %v401_v62 = vld [vmem:[%s1141_s4] sm:$0x3] }
  0x68   : > { %650 = vmatpush3.msra.mxu0 %v277_v17  ;;  %428 = vmatpush1.msra.mxu1 %v385_v33  ;;  %v410_v63 = vrot.slane %v401_v62, %v409_v61  ;;  %v406_v7 = vrot.slane %v401_v62, %v405_v6 }
  0x69   : > { %651 = vmatprep.subr.mxu0 %v904_v0  ;;  %429 = vmatprep.subr.mxu1 %v384_v34 }
  0x6a   : > { %652 = vmatpush3.msra.mxu0 %v276_v18  ;;  %430 = vmatpush1.msra.mxu1 %v383_v35 }
  0x6b   : > { %653 = vmatprep.subr.mxu0 %v904_v0  ;;  %431 = vmatprep.subr.mxu1 %v382_v36 }
  0x6c   : > { %654 = vmatpush3.msra.mxu0 %v275_v19  ;;  %432 = vmatpush1.msra.mxu1 %v381_v37 }
  0x6d   : > { %655 = vmatprep.subr.mxu0 %v904_v0  ;;  %433 = vmatprep.subr.mxu1 %v380_v38 }
  0x6e   : > { %656 = vmatpush3.msra.mxu0 %v274_v20  ;;  %434 = vmatpush1.msra.mxu1 %v379_v39 }
  0x6f   : > { %657 = vmatprep.subr.mxu0 %v904_v0  ;;  %435 = vmatprep.subr.mxu1 %v378_v40 }
  0x70   : > { %658 = vmatpush3.msra.mxu0 %v273_v21  ;;  %436 = vmatpush1.msra.mxu1 %v377_v41 }
  0x71   : > { %659 = vmatprep.subr.mxu0 %v904_v0  ;;  %437 = vmatprep.subr.mxu1 %v376_v42 }
  0x72   : > { %660 = vmatpush3.msra.mxu0 %v272_v22  ;;  %438 = vmatpush1.msra.mxu1 %v375_v43 }
  0x73   : > { %661 = vmatprep.subr.mxu0 %v904_v0  ;;  %439 = vmatprep.subr.mxu1 %v374_v44 }
  0x74   : > { %662 = vmatpush3.msra.mxu0 %v271_v23  ;;  %440 = vmatpush1.msra.mxu1 %v373_v45 }
  0x75   : > { %663 = vmatprep.subr.mxu0 %v904_v0  ;;  %441 = vmatprep.subr.mxu1 %v372_v46 }
  0x76   : > { %664 = vmatpush3.msra.mxu0 %v270_v24  ;;  %442 = vmatpush1.msra.mxu1 %v371_v47 }
  0x77   : > { %666 = vmatmul.mubr.f32.vlgmr.msra.gmra.mxu0 %v1089_v25  ;;  %443 = vmatprep.subr.mxu1 %v370_v48 }
  0x78   : > { %444 = vmatpush1.msra.mxu1 %v369_v49 }
 0x137   : > { %v359_v51 = vpop.f32.mrf.mxu0 }
 0x138   : > { %v360_v52 = vadd.f32 %v609_v50, %v359_v51 }
 0x139   : > { %v667_v53 = vpop.f32.mrf.mxu0 }
 0x13a   : > { %v364_v54 = vmin.f32 %v360_v52, 0.0  ;;  %vm363_vm1 = vcmp.gt.f32.partialorder %v360_v52, 0.0 }
 0x13c   : > { %v365_v55 = vmul.f32 1.442695, %v364_v54 }
 0x13e   : > { %741 = vpow2.f32 %v365_v55 }
 0x14b   : > { %v742_v56 = vpop.eup %741 }
 0x14c   : > { %v610_v57 = vadd.f32 -1.0, %v742_v56 }
 0x14e   : > { %v368_v58 = vsel %vm363_vm1, %v360_v52, %v610_v57 }
 0x14f   : > { %478 = vmatmul.mubr.f32.vlgmr.msra.gmra.mxu1 %v368_v58 }
 0x20f   : > { %v479_v0 = vpop.f32.mrf.mxu1 }
 0x210   : > { %v480_v8 = vadd.f32 %v479_v0, %v406_v7 }
 0x211   : > { %v481_v1 = vpop.f32.mrf.mxu1 }
 0x212   : > { %v482_v2 = vadd.f32 %v481_v1, %v410_v63  ;;  %v490_v9 = vsub.f32 %v1089_v25, %v480_v8 }
 0x214   : > { %v611_v3 = vmul.f32 -1.442695, %v482_v2 }
 0x216   : > { %743 = vpow2.f32 %v611_v3 }
 0x223   : > { %v744_v4 = vpop.eup %743 }
 0x224   : > { %v487_v5 = vadd.f32 1.0, %v744_v4 }
 0x226   : > { %745 = vrcp.f32 %v487_v5 }
 0x233   : > { %v746_v10 = vpop.eup %745 }
 0x234   : > { %v491_v11 = vmul.f32 %v746_v10, %v490_v9 }
 0x236   : > { %v492_v12 = vadd.f32 %v491_v11, %v480_v8 }
 0x238   : > { %493 = vst [vmem:[%s268_s14] sm:$0xff] %v492_v12 }
 0x239   : > { %840 = shalt.err (!%p837_p9)
}
 0x23a   : > { %s841_s16 = scalar_lea.hbm %s506_s29, 128  ;;  %s845_s26 = scalar_lea.hbm %s1142_s5, 256 }
 0x23b   : > { %p842_p13 = scmp.ne.s32.totalorder %s506_s29, %s841_s16  ;;  %p846_p4 = scmp.lt.s32.totalorder %s506_s29, %s1142_s5 }
 0x23c   : > { %p847_p8 = scmp.lt.s32.totalorder %s845_s26, %s841_s16 }
 0x23d   : > { %p843_p5 = pnand %p842_p13, %p1158_p0 }
 0x23e   : > { %p848_p7 = por %p847_p8, %p846_p4 }
 0x23f   : > { %p844_p10 = pneg %p843_p5 }
 0x241   : > { %p849_p11 = pnand %p848_p7, %p844_p10 }
 0x243   : > { %852 = shalt.err (!%p849_p11)
}
 0x244   : > { %678 = dma.vmem_to_hbm [thread:$0]  (%p1158_p0), %s509_s6, 128, %s506_s29, %s495_s9  }
 0x245 PF: > { %s520_s13 = sand.u32 1, %s883_s18   ;;  %p1159_p1 = scmp.ne.s32.totalorder %s1148_s25, 0 }
 0x246   : > { %p1160_p2 = scmp.ge.s32.totalorder %s895_s21, 2  ;;  %s521_s14 = scalar_lea.sflag [#allocation4], %s520_s13 }
 0x248   : > { %p692_p6 = pnand %p1160_p2, %p1159_p1 }
 0x24a   : > { %p693_p12 = pneg %p692_p6 }
 0x24c   : > { %878 = dma.done.wait (%p693_p12), %s521_s14, 128  }
 0x24d   : > { %880 = vsyncadd (%p693_p12), %s521_s14, 4294967168  ;;  %p19_p3 = scmp.ge.s32.totalorder %s1009_s17, 4   ;;  %s1161_s18 = smov %s887_s19 }
 0x24e   : > { %s1162_s19 = smov %s891_s20  ;;  %s1163_s20 = smov %s1018_s28 }
 0x24f   : > { %s1164_s21 = smov %s1009_s17  ;;  %21 = sbr.rel (!%p19_p3) target bundleno = 6 (0x6), region = 93 }
 0x254   :  { %526 = vsyncpa [#allocation3], 1 }
 0x255   :  { %528 = vsyncpa [#allocation3 + $0x1], 1 }
 0x256   :  { %529 = vsyncpa [#allocation6], 1 }
 0x257   :  { %530 = vsyncpa [#allocation4], 1 }
 0x258   :  { %532 = vsyncpa [#allocation4 + $0x1], 1 }

// kernel: tpu_custom_call.1
= control target key start
LH: loop header
LB: loop body
LE: loop exit
PB: predicated region body
PF: predicated region fallthrough
CT: control target
= control target key end

     0   :  { %10 = vsyncpa [#allocation3], 0  ;;  %s1137_s0 = inlined_call_operand.hbm [shape: f32[16,128], index: 0, kind: input, shape index: {}]   ;;  %s1138_s1 = inlined_call_operand.hbm [shape: f32[128,128], index: 1, kind: input, shape index: {}]   ;;  %s1139_s2 = inlined_call_operand.vmem [shape: f32[1,128], index: 2, kind: input, shape index: {}]   ;;  %s1140_s3 = inlined_call_operand.hbm [shape: f32[128,256], index: 3, kind: input, shape index: {}]   ;;  %s1141_s4 = inlined_call_operand.vmem [shape: f32[1,256], index: 4, kind: input, shape index: {}]   ;;  %s1142_s5 = inlined_call_operand.hbm [shape: f32[16,128], index: 5, kind: output, shape index: {}]  }
   0x1   :  { %12 = vsyncpa [#allocation3 + $0x1], 0 }
   0x2   :  { %13 = vsyncpa [#allocation6], 0 }
   0x3   :  { %14 = vsyncpa [#allocation4], 0 }
   0x4   :  { %16 = vsyncpa [#allocation4 + $0x1], 0  ;;  %s937_s18 = smov 0   ;;  %s939_s19 = smov 0  }
   0x5   :  { %s941_s20 = smov 0   ;;  %s943_s21 = smov 0  }
   0x6 LB: > { %s958_s22 = sadd.s32 4294967295, %s895_s21   ;;  %s597_s23 = sadd.s32 4294967294, %s895_s21   ;;  %s895_s21 = sphi %s943_s21, %s1164_s21   ;;  %s891_s20 = sphi %s941_s20, %s1163_s20   ;;  %s887_s19 = sphi %s939_s19, %s1162_s19   ;;  %s883_s18 = sphi %s937_s18, %s1161_s18  }
   0x7   : > { %p42_p0 = scmp.ne.s32.totalorder %s887_s19, %s883_s18  ;;  %p1143_p1 = scmp.eq.s32.totalorder %s958_s22, 0 }
   0x8   : > { %p156_p3 = scmp.eq.s32.totalorder %s597_s23, 1  ;;  %p598_p5 = scmp.ge.s32.totalorder %s895_s21, 1 }
   0x9   : > { %p967_p4 = por %p1143_p1, %p42_p0  ;;  %p163_p7 = scmp.lt.s32.totalorder %s895_s21, 3 }
   0xa   : > { %p972_p6 = por %p156_p3, %p42_p0  ;;  %s897_s27 = smov [#allocation5]  }
   0xb   : > { %s1147_s24 = scalar_select %p967_p4, 1, 0 }
   0xc   : > { %s1148_s25 = scalar_select %p972_p6, 1, 0 }
   0xd   : > { %p977_p8 = pnand %p598_p5, %p163_p7  ;;  %s175_s28 = sshll.u32 %s897_s27, 4  ;;  %s176_s28 = int_to_ptr.vmem [resolvable:$true] %s175_s28 }
   0xe   : > { %s898_s30 = smov [#allocation7]   ;;  %s758_s7 = scalar_lea.vmem %s176_s28, 2048 }
   0xf   : > { %s1149_s26 = scalar_select %p977_p8, 1, 0 }
  0x10   : > { %p680_p9 = pneg %p977_p8  ;;  %s191_s6 = sshll.u32 %s898_s30, 4  ;;  %s192_s6 = int_to_ptr.vmem [resolvable:$true] %s191_s6 }
  0x11   : > { %p759_p13 = scmp.ne.s32.totalorder %s176_s28, %s758_s7  ;;  %p766_p5 = scmp.lt.s32.totalorder %s176_s28, %s176_s28 }
  0x12   : > { %p986_p11 = pnand %p680_p9, %p1143_p1  ;;  %p767_p7 = scmp.lt.s32.totalorder %s758_s7, %s758_s7 }
  0x14   : > { %p749_p12 = pneg %p986_p11  ;;  %p768_p10 = por %p767_p7, %p766_p5 }
  0x16   : > { %p761_p0 = pnand %p759_p13, %p749_p12 }
  0x18   : > { %p762_p3 = pneg %p761_p0 }
  0x1a   : > { %p769_p9 = pnand %p768_p10, %p762_p3 }
  0x1c   : > { %772 = shalt.err (!%p769_p9)
}
  0x1d   : > { %s899_s8 = smov 128   ;;  %s900_s9 = smov 8  }
  0x1e   : > { %683 = dma.hbm_to_vmem [thread:$0]  (!%p986_p11), %s1138_s1, 2048, %s176_s28, [#allocation6], %s899_s8, %s899_s8, %s900_s9  }
  0x1f   : > { %s784_s12 = scalar_lea.vmem %s192_s6, 4096  ;;  %p792_p2 = scmp.lt.s32.totalorder %s192_s6, %s192_s6 }
  0x20   : > { %p785_p1 = scmp.ne.s32.totalorder %s192_s6, %s784_s12  ;;  %p793_p6 = scmp.lt.s32.totalorder %s784_s12, %s784_s12 }
  0x22   : > { %p787_p13 = pnand %p785_p1, %p749_p12  ;;  %p794_p5 = por %p793_p6, %p792_p2 }
  0x24   : > { %p788_p0 = pneg %p787_p13 }
  0x26   : > { %p795_p10 = pnand %p794_p5, %p788_p0 }
  0x28   : > { %798 = shalt.err (!%p795_p10)
}
  0x29   : > { %s901_s13 = smov 256   ;;  %s902_s14 = smov 16  }
  0x2a   : > { %686 = dma.hbm_to_vmem [thread:$0]  (!%p986_p11), %s1140_s3, 4096, %s192_s6, [#allocation6], %s901_s13, %s901_s13, %s902_s14  }
  0x2b   : > { %s1009_s17 = sadd.s32 1, %s895_s21   ;;  %s29_s27 = sadd.s32 1, %s891_s20 }
  0x2c   : > { %s26_s23 = ssub.s32 %s895_s21, %s1009_s17  ;;  %p36_p2 = scmp.ne.s32.totalorder %s891_s20, %s887_s19 }
  0x2d   : > { %p27_p1 = scmp.eq.s32.totalorder %s26_s23, 0  ;;  %p37_p6 = scmp.eq.s32.totalorder %s895_s21, 0 }
  0x2e   : > { %p1151_p3 = scmp.eq.s32.totalorder %s958_s22, 1  ;;  %p697_p9 = scmp.lt.s32.totalorder %s895_s21, 2 }
  0x2f   : > { %s1018_s28 = scalar_select %p27_p1, %s891_s20, %s29_s27  }
  0x30   : > { %p38_p12 = por %p37_p6, %p36_p2  ;;  %p1022_p7 = por %p1151_p3, %p36_p2 }
  0x31   : > { %s208_s29 = sand.u32 1, %s891_s20   ;;  %s603_s6 = sshll.u32 %s895_s21, 7 }
  0x32   : > { %s1152_s30 = scalar_select %p1022_p7, 1, 0 }
  0x33   : > { %s602_s7 = sshll.u32 %s208_s29, 3  ;;  %s1032_s10 = scalar_lea.hbm %s1137_s0, %s603_s6 }
  0x34   : > { %s212_s11 = scalar_lea.vmem [#allocation2], %s602_s7  ;;  %p1034_p11 = pnand %p697_p9, %p38_p12 }
  0x35   : > { %s219_s12 = sshll.u32 %s212_s11, 4  ;;  %s209_s14 = scalar_lea.sflag [#allocation3], %s208_s29  ;;  %s220_s12 = int_to_ptr.vmem [resolvable:$true] %s219_s12 }
  0x36   : > { %s799_s15 = scalar_lea.hbm %s1032_s10, 128  ;;  %p801_p0 = pneg %p1034_p11 }
  0x37   : > { %p800_p13 = scmp.ne.s32.totalorder %s1032_s10, %s799_s15  ;;  %s804_s27 = scalar_lea.hbm %s1137_s0, 256 }
  0x38   : > { %p805_p1 = scmp.lt.s32.totalorder %s1032_s10, %s1137_s0  ;;  %p806_p2 = scmp.lt.s32.totalorder %s804_s27, %s799_s15 }
  0x39   : > { %p802_p5 = pnand %p801_p0, %p800_p13 }
  0x3a   : > { %p807_p6 = por %p806_p2, %p805_p1 }
  0x3b   : > { %p803_p10 = pneg %p802_p5 }
  0x3d   : > { %p808_p12 = pnand %p807_p6, %p803_p10 }
  0x3f   : > { %811 = shalt.err (!%p808_p12)
}
  0x40   : > { %s812_s8 = scalar_lea.vmem %s220_s12, 128  ;;  %s903_s29 = smov [#allocation2]  }
  0x41   : > { %p813_p3 = scmp.ne.s32.totalorder %s220_s12, %s812_s8  ;;  %s817_s9 = sshll.u32 %s903_s29, 4  ;;  %s818_s9 = int_to_ptr.vmem [resolvable:$false] %s817_s9 }
  0x42   : > { %s819_s11 = scalar_lea.vmem %s818_s9, 256  ;;  %p820_p13 = scmp.lt.s32.totalorder %s220_s12, %s818_s9 }
  0x43   : > { %p815_p9 = pnand %p813_p3, %p801_p0  ;;  %p821_p5 = scmp.lt.s32.totalorder %s819_s11, %s812_s8 }
  0x45   : > { %p816_p7 = pneg %p815_p9  ;;  %p822_p4 = por %p821_p5, %p820_p13 }
  0x47   : > { %p823_p8 = pnand %p822_p4, %p816_p7 }
  0x49   : > { %826 = shalt.err (!%p823_p8)
}
  0x4a   : > { %690 = dma.hbm_to_vmem [thread:$0]  (!%p1034_p11), %s1032_s10, 128, %s220_s12, %s209_s14  }
  0x4b   : > { %p1154_p10 = scmp.ne.s32.totalorder %s1149_s26, 0 }
  0x4c   : > { %s1055_s15 = sand.u32 (!%p1154_p10), 1, %s887_s19   ;;  %p1155_p4 = scmp.ne.s32.totalorder (!%p1154_p10), %s1147_s24, 0 }
  0x4d   : > { %228 = sbr.rel (%p1154_p10) target bundleno = 581 (0x245), region = 40  ;;  %s605_s16 = sshll.u32 (!%p1154_p10), %s1055_s15, 3 }
  0x4e   : > { %s231_s23 = scalar_lea.sflag (!%p1154_p10), [#allocation3], %s1055_s15  ;;  %s1061_s27 = scalar_lea.vmem (!%p1154_p10), [#allocation2], %s605_s16 }
  0x52   : > { %870 = dma.done.wait (%p1155_p4), %s231_s23, 128  }
  0x53   : > { %872 = vsyncadd (%p1155_p4), %s231_s23, 4294967168  ;;  %p1156_p8 = scmp.eq.s32.totalorder %s958_s22, 0 }
  0x55   : > { %874 = dma.done.wait (%p1156_p8), [#allocation6], 6144   ;;  %p1157_p7 = pmov %p1156_p8 }
  0x56   : > { %v904_v0 = vmov 0.0   ;;  %vm905_vm0 = vmmov 0   ;;  %v285_v1 = vld [vmem:[#allocation5 + $0x78] sm:$0xff]  ;;  %v284_v2 = vld [vmem:[#allocation5 + $0x70] sm:$0xff]  ;;  %v283_v3 = vld [vmem:[#allocation5 + $0x68] sm:$0xff]  ;;  %v403_v59 = vlaneseq  ;;  %s613_s13 = sshll.u32 %s958_s22, 7 }
  0x57   : > { %876 = vsyncadd (%p1157_p7), [#allocation6], 4294961152  ;;  %633 = vmatprep.subr.mxu0 %v904_v0  ;;  %665 = vmatprep.mubr.msk.f32.mxu0 %vm905_vm0, %v904_v0  ;;  %v282_v4 = vld [vmem:[#allocation5 + $0x60] sm:$0xff]  ;;  %v281_v5 = vld [vmem:[#allocation5 + $0x58] sm:$0xff]  ;;  %s268_s14 = scalar_lea.vmem [#allocation8], %s605_s16  ;;  %s506_s29 = scalar_lea.hbm %s1142_s5, %s613_s13 }
  0x58   : > { %477 = vmatprep.mubr.f32.mxu1 %v904_v0  ;;  %634 = vmatpush3.msra.mxu0 %v285_v1  ;;  %v400_v6 = vld [vmem:[#allocation7 + $0xf8] sm:$0xff]  ;;  %v399_v7 = vld [vmem:[#allocation7 + $0xf0] sm:$0xff]  ;;  %v398_v8 = vld [vmem:[#allocation7 + $0xe8] sm:$0xff]  ;;  %v404_v60 = vshrl.u32 %v403_v59, 7  ;;  %s508_s6 = sshll.u32 %s268_s14, 4  ;;  %s495_s9 = scalar_lea.sflag [#allocation4], %s1055_s15  ;;  %s509_s6 = int_to_ptr.vmem [resolvable:$true] %s508_s6 }
  0x59   : > { %635 = vmatprep.subr.mxu0 %v904_v0  ;;  %413 = vmatprep.subr.mxu1 %v400_v6  ;;  %v397_v9 = vld [vmem:[#allocation7 + $0xe0] sm:$0xff]  ;;  %v396_v10 = vld [vmem:[#allocation7 + $0xd8] sm:$0xff]  ;;  %v280_v11 = vld [vmem:[#allocation5 + $0x50] sm:$0xff]  ;;  %s827_s11 = scalar_lea.vmem %s509_s6, 128  ;;  %p1158_p0 = scmp.ne.s32.totalorder %s1152_s30, 0 }
  0x5a   : > { %636 = vmatpush3.msra.mxu0 %v284_v2  ;;  %414 = vmatpush1.msra.mxu1 %v399_v7  ;;  %v395_v12 = vld [vmem:[#allocation7 + $0xd0] sm:$0xff]  ;;  %v394_v13 = vld [vmem:[#allocation7 + $0xc8] sm:$0xff]  ;;  %v393_v15 = vld [vmem:[#allocation7 + $0xc0] sm:$0xff]  ;;  %v409_v61 = vsub.s32 1, %v404_v60  ;;  %v405_v6 = vsub.s32 0, %v404_v60  ;;  %p828_p11 = scmp.ne.s32.totalorder %s509_s6, %s827_s11  ;;  %s906_s23 = smov [#allocation8]  }
  0x5b   : > { %637 = vmatprep.subr.mxu0 %v904_v0  ;;  %415 = vmatprep.subr.mxu1 %v398_v8  ;;  %v279_v14 = vld [vmem:[#allocation5 + $0x48] sm:$0xff]  ;;  %v278_v16 = vld [vmem:[#allocation5 + $0x40] sm:$0xff]  ;;  %v277_v17 = vld [vmem:[#allocation5 + $0x38] sm:$0xff] }
  0x5c   : > { %638 = vmatpush3.msra.mxu0 %v283_v3  ;;  %416 = vmatpush1.msra.mxu1 %v397_v9  ;;  %v276_v18 = vld [vmem:[#allocation5 + $0x30] sm:$0xff]  ;;  %v275_v19 = vld [vmem:[#allocation5 + $0x28] sm:$0xff]  ;;  %v274_v20 = vld [vmem:[#allocation5 + $0x20] sm:$0xff]  ;;  %p829_p1 = pnand %p828_p11, %p1158_p0 }
  0x5d   : > { %639 = vmatprep.subr.mxu0 %v904_v0  ;;  %417 = vmatprep.subr.mxu1 %v396_v10  ;;  %v273_v21 = vld [vmem:[#allocation5 + $0x18] sm:$0xff]  ;;  %v272_v22 = vld [vmem:[#allocation5 + $0x10] sm:$0xff]  ;;  %v271_v23 = vld [vmem:[#allocation5 + $0x8] sm:$0xff] }
  0x5e   : > { %640 = vmatpush3.msra.mxu0 %v282_v4  ;;  %418 = vmatpush1.msra.mxu1 %v395_v12  ;;  %v270_v24 = vld [vmem:[#allocation5] sm:$0xff]  ;;  %v1089_v25 = vld [vmem:[%s1061_s27] sm:$0xff]  ;;  %v390_v28 = vld [vmem:[#allocation7 + $0xa8] sm:$0xff]  ;;  %p830_p2 = pneg %p829_p1  ;;  %s831_s27 = sshll.u32 %s906_s23, 4  ;;  %s832_s27 = int_to_ptr.vmem [resolvable:$false] %s831_s27 }
  0x5f   : > { %641 = vmatprep.subr.mxu0 %v904_v0  ;;  %419 = vmatprep.subr.mxu1 %v394_v13  ;;  %v392_v26 = vld [vmem:[#allocation7 + $0xb8] sm:$0xff]  ;;  %v391_v27 = vld [vmem:[#allocation7 + $0xb0] sm:$0xff]  ;;  %v389_v29 = vld [vmem:[#allocation7 + $0xa0] sm:$0xff]  ;;  %s833_s22 = scalar_lea.vmem %s832_s27, 256  ;;  %p834_p6 = scmp.lt.s32.totalorder %s509_s6, %s832_s27 }
  0x60   : > { %642 = vmatpush3.msra.mxu0 %v281_v5  ;;  %420 = vmatpush1.msra.mxu1 %v393_v15  ;;  %v388_v30 = vld [vmem:[#allocation7 + $0x98] sm:$0xff]  ;;  %v387_v31 = vld [vmem:[#allocation7 + $0x90] sm:$0xff]  ;;  %v386_v32 = vld [vmem:[#allocation7 + $0x88] sm:$0xff]  ;;  %p835_p12 = scmp.lt.s32.totalorder %s833_s22, %s827_s11 }
  0x61   : > { %643 = vmatprep.subr.mxu0 %v904_v0  ;;  %421 = vmatprep.subr.mxu1 %v392_v26  ;;  %v385_v33 = vld [vmem:[#allocation7 + $0x80] sm:$0xff]  ;;  %v384_v34 = vld [vmem:[#allocation7 + $0x78] sm:$0xff]  ;;  %v383_v35 = vld [vmem:[#allocation7 + $0x70] sm:$0xff] }
  0x62   : > { %644 = vmatpush3.msra.mxu0 %v280_v11  ;;  %422 = vmatpush1.msra.mxu1 %v391_v27  ;;  %v382_v36 = vld [vmem:[#allocation7 + $0x68] sm:$0xff]  ;;  %v381_v37 = vld [vmem:[#allocation7 + $0x60] sm:$0xff]  ;;  %v380_v38 = vld [vmem:[#allocation7 + $0x58] sm:$0xff]  ;;  %p836_p3 = por %p835_p12, %p834_p6 }
  0x63   : > { %645 = vmatprep.subr.mxu0 %v904_v0  ;;  %423 = vmatprep.subr.mxu1 %v390_v28  ;;  %v379_v39 = vld [vmem:[#allocation7 + $0x50] sm:$0xff]  ;;  %v378_v40 = vld [vmem:[#allocation7 + $0x48] sm:$0xff]  ;;  %v377_v41 = vld [vmem:[#allocation7 + $0x40] sm:$0xff] }
  0x64   : > { %646 = vmatpush3.msra.mxu0 %v279_v14  ;;  %424 = vmatpush1.msra.mxu1 %v389_v29  ;;  %v376_v42 = vld [vmem:[#allocation7 + $0x38] sm:$0xff]  ;;  %v375_v43 = vld [vmem:[#allocation7 + $0x30] sm:$0xff]  ;;  %v374_v44 = vld [vmem:[#allocation7 + $0x28] sm:$0xff]  ;;  %p837_p9 = pnand %p836_p3, %p830_p2 }
  0x65   : > { %647 = vmatprep.subr.mxu0 %v904_v0  ;;  %425 = vmatprep.subr.mxu1 %v388_v30  ;;  %v373_v45 = vld [vmem:[#allocation7 + $0x20] sm:$0xff]  ;;  %v372_v46 = vld [vmem:[#allocation7 + $0x18] sm:$0xff]  ;;  %v371_v47 = vld [vmem:[#allocation7 + $0x10] sm:$0xff] }
  0x66   : > { %648 = vmatpush3.msra.mxu0 %v278_v16  ;;  %426 = vmatpush1.msra.mxu1 %v387_v31  ;;  %v370_v48 = vld [vmem:[#allocation7 + $0x8] sm:$0xff]  ;;  %v369_v49 = vld [vmem:[#allocation7] sm:$0xff]  ;;  %v609_v50 = vld [vmem:[%s1139_s2] ss:$0 sm:$0xff] }
  0x67   : > { %649 = vmatprep.subr.mxu0 %v904_v0  ;;  %427 = vmatprep.subr.mxu1 %v386_v32  ;;  %v401_v62 = vld [vmem:[%s1141_s4] sm:$0x3] }
  0x68   : > { %650 = vmatpush3.msra.mxu0 %v277_v17  ;;  %428 = vmatpush1.msra.mxu1 %v385_v33  ;;  %v410_v63 = vrot.slane %v401_v62, %v409_v61  ;;  %v406_v7 = vrot.slane %v401_v62, %v405_v6 }
  0x69   : > { %651 = vmatprep.subr.mxu0 %v904_v0  ;;  %429 = vmatprep.subr.mxu1 %v384_v34 }
  0x6a   : > { %652 = vmatpush3.msra.mxu0 %v276_v18  ;;  %430 = vmatpush1.msra.mxu1 %v383_v35 }
  0x6b   : > { %653 = vmatprep.subr.mxu0 %v904_v0  ;;  %431 = vmatprep.subr.mxu1 %v382_v36 }
  0x6c   : > { %654 = vmatpush3.msra.mxu0 %v275_v19  ;;  %432 = vmatpush1.msra.mxu1 %v381_v37 }
  0x6d   : > { %655 = vmatprep.subr.mxu0 %v904_v0  ;;  %433 = vmatprep.subr.mxu1 %v380_v38 }
  0x6e   : > { %656 = vmatpush3.msra.mxu0 %v274_v20  ;;  %434 = vmatpush1.msra.mxu1 %v379_v39 }
  0x6f   : > { %657 = vmatprep.subr.mxu0 %v904_v0  ;;  %435 = vmatprep.subr.mxu1 %v378_v40 }
  0x70   : > { %658 = vmatpush3.msra.mxu0 %v273_v21  ;;  %436 = vmatpush1.msra.mxu1 %v377_v41 }
  0x71   : > { %659 = vmatprep.subr.mxu0 %v904_v0  ;;  %437 = vmatprep.subr.mxu1 %v376_v42 }
  0x72   : > { %660 = vmatpush3.msra.mxu0 %v272_v22  ;;  %438 = vmatpush1.msra.mxu1 %v375_v43 }
  0x73   : > { %661 = vmatprep.subr.mxu0 %v904_v0  ;;  %439 = vmatprep.subr.mxu1 %v374_v44 }
  0x74   : > { %662 = vmatpush3.msra.mxu0 %v271_v23  ;;  %440 = vmatpush1.msra.mxu1 %v373_v45 }
  0x75   : > { %663 = vmatprep.subr.mxu0 %v904_v0  ;;  %441 = vmatprep.subr.mxu1 %v372_v46 }
  0x76   : > { %664 = vmatpush3.msra.mxu0 %v270_v24  ;;  %442 = vmatpush1.msra.mxu1 %v371_v47 }
  0x77   : > { %666 = vmatmul.mubr.f32.vlgmr.msra.gmra.mxu0 %v1089_v25  ;;  %443 = vmatprep.subr.mxu1 %v370_v48 }
  0x78   : > { %444 = vmatpush1.msra.mxu1 %v369_v49 }
 0x137   : > { %v359_v51 = vpop.f32.mrf.mxu0 }
 0x138   : > { %v360_v52 = vadd.f32 %v609_v50, %v359_v51 }
 0x139   : > { %v667_v53 = vpop.f32.mrf.mxu0 }
 0x13a   : > { %v364_v54 = vmin.f32 %v360_v52, 0.0  ;;  %vm363_vm1 = vcmp.gt.f32.partialorder %v360_v52, 0.0 }
 0x13c   : > { %v365_v55 = vmul.f32 1.442695, %v364_v54 }
 0x13e   : > { %741 = vpow2.f32 %v365_v55 }
 0x14b   : > { %v742_v56 = vpop.eup %741 }
 0x14c   : > { %v610_v57 = vadd.f32 -1.0, %v742_v56 }
 0x14e   : > { %v368_v58 = vsel %vm363_vm1, %v360_v52, %v610_v57 }
 0x14f   : > { %478 = vmatmul.mubr.f32.vlgmr.msra.gmra.mxu1 %v368_v58 }
 0x20f   : > { %v479_v0 = vpop.f32.mrf.mxu1 }
 0x210   : > { %v480_v8 = vadd.f32 %v479_v0, %v406_v7 }
 0x211   : > { %v481_v1 = vpop.f32.mrf.mxu1 }
 0x212   : > { %v482_v2 = vadd.f32 %v481_v1, %v410_v63  ;;  %v490_v9 = vsub.f32 %v1089_v25, %v480_v8 }
 0x214   : > { %v611_v3 = vmul.f32 -1.442695, %v482_v2 }
 0x216   : > { %743 = vpow2.f32 %v611_v3 }
 0x223   : > { %v744_v4 = vpop.eup %743 }
 0x224   : > { %v487_v5 = vadd.f32 1.0, %v744_v4 }
 0x226   : > { %745 = vrcp.f32 %v487_v5 }
 0x233   : > { %v746_v10 = vpop.eup %745 }
 0x234   : > { %v491_v11 = vmul.f32 %v746_v10, %v490_v9 }
 0x236   : > { %v492_v12 = vadd.f32 %v491_v11, %v480_v8 }
 0x238   : > { %493 = vst [vmem:[%s268_s14] sm:$0xff] %v492_v12 }
 0x239   : > { %840 = shalt.err (!%p837_p9)
}
 0x23a   : > { %s841_s16 = scalar_lea.hbm %s506_s29, 128  ;;  %s845_s26 = scalar_lea.hbm %s1142_s5, 256 }
 0x23b   : > { %p842_p13 = scmp.ne.s32.totalorder %s506_s29, %s841_s16  ;;  %p846_p4 = scmp.lt.s32.totalorder %s506_s29, %s1142_s5 }
 0x23c   : > { %p847_p8 = scmp.lt.s32.totalorder %s845_s26, %s841_s16 }
 0x23d   : > { %p843_p5 = pnand %p842_p13, %p1158_p0 }
 0x23e   : > { %p848_p7 = por %p847_p8, %p846_p4 }
 0x23f   : > { %p844_p10 = pneg %p843_p5 }
 0x241   : > { %p849_p11 = pnand %p848_p7, %p844_p10 }
 0x243   : > { %852 = shalt.err (!%p849_p11)
}
 0x244   : > { %678 = dma.vmem_to_hbm [thread:$0]  (%p1158_p0), %s509_s6, 128, %s506_s29, %s495_s9  }
 0x245 PF: > { %s520_s13 = sand.u32 1, %s883_s18   ;;  %p1159_p1 = scmp.ne.s32.totalorder %s1148_s25, 0 }
 0x246   : > { %p1160_p2 = scmp.ge.s32.totalorder %s895_s21, 2  ;;  %s521_s14 = scalar_lea.sflag [#allocation4], %s520_s13 }
 0x248   : > { %p692_p6 = pnand %p1160_p2, %p1159_p1 }
 0x24a   : > { %p693_p12 = pneg %p692_p6 }
 0x24c   : > { %878 = dma.done.wait (%p693_p12), %s521_s14, 128  }
 0x24d   : > { %880 = vsyncadd (%p693_p12), %s521_s14, 4294967168  ;;  %p19_p3 = scmp.ge.s32.totalorder %s1009_s17, 4   ;;  %s1161_s18 = smov %s887_s19 }
 0x24e   : > { %s1162_s19 = smov %s891_s20  ;;  %s1163_s20 = smov %s1018_s28 }
 0x24f   : > { %s1164_s21 = smov %s1009_s17  ;;  %21 = sbr.rel (!%p19_p3) target bundleno = 6 (0x6), region = 93 }
 0x254   :  { %526 = vsyncpa [#allocation3], 1 }
 0x255   :  { %528 = vsyncpa [#allocation3 + $0x1], 1 }
 0x256   :  { %529 = vsyncpa [#allocation6], 1 }
 0x257   :  { %530 = vsyncpa [#allocation4], 1 }
 0x258   :  { %532 = vsyncpa [#allocation4 + $0x1], 1 }

</bundles_post_ra>
